<compile_context>
chip_gen: v7x
topology: tpu7x:2x2x1
jax: 0.10.0
libtpu: 0.0.40
codegen_flags: <defaults>
</compile_context>

<pallas_src>
import functools

import jax
import jax.numpy as jnp
from jax.experimental import pallas as pl
from jax.experimental.pallas import tpu as pltpu

_TM_BIG = 256
_TM_MID = 128
_RED_TARGET_ELEMS = 512 * 1024     # ~2 MB f32 per reducer block
_RED_ROW_CAP = 4096
_GRAM_THW = 1024
_VMEM_LIMIT = 32 * 1024 * 1024     # safe on v5e/v6e (128 MiB) and v7x (64 MiB)


def _cp(semantics):
    return pltpu.CompilerParams(dimension_semantics=semantics,
                                vmem_limit_bytes=_VMEM_LIMIT)


# ---------------------------------------------------------------------------
# Pallas kernel 1: conv matmul with VMEM-resident weights, fused bias + act,
# f32 accumulate in registers, bf16 (or f32) store.
# ---------------------------------------------------------------------------
def _activate(z, act):
    if act == "relu":
        return jnp.maximum(z, 0.0)
    if act == "lrelu":
        return jnp.where(z > 0, z, 0.2 * z)
    if act == "sigmoid":
        return jax.nn.sigmoid(z)
    return z


def _mm_kernel(a_ref, w_ref, b_ref, o_ref, *, act):
    z = jnp.dot(a_ref[...], w_ref[...], preferred_element_type=jnp.float32)
    z = _activate(z + b_ref[...], act)
    o_ref[...] = z.astype(o_ref.dtype)


def _pick_tm(M):
    for t in (_TM_BIG, _TM_MID):
        if M % t == 0:
            return t
    if M <= _TM_BIG:
        return M                      # full-extent single block along M
    return _TM_MID                    # ragged last block (writes clipped)


@functools.lru_cache(maxsize=None)
def _matmul_callable(M, K, N, TM, act, out_dtype_name):
    out_dtype = jnp.dtype(out_dtype_name)
    grid_m = pl.cdiv(M, TM)
    return pl.pallas_call(
        functools.partial(_mm_kernel, act=act),
        out_shape=jax.ShapeDtypeStruct((M, N), out_dtype),
        grid_spec=pltpu.PrefetchScalarGridSpec(
            num_scalar_prefetch=0,
            grid=(grid_m,),
            in_specs=[
                pl.BlockSpec((TM, K), lambda i: (i, 0)),
                pl.BlockSpec((K, N), lambda i: (0, 0)),   # resident weight
                pl.BlockSpec((1, N), lambda i: (0, 0)),   # resident bias
            ],
            out_specs=pl.BlockSpec((TM, N), lambda i: (i, 0))),
        compiler_params=_cp(("parallel",)),
    )


def _prep_conv(w, b):
    """Pre-cast conv weights to bf16 once at init (no padding needed)."""
    K, N = w.shape
    return {"w": w.astype(jnp.bfloat16),
            "b": b.astype(jnp.float32).reshape(1, N),
            "N": N}


def conv_matmul(a, params, act="none", out_dtype=jnp.bfloat16):
    """act(a @ w + b); a: (M, K) bf16 im2col patches, w fully VMEM-resident."""
    M, K = a.shape
    N = params["N"]
    TM = _pick_tm(M)
    fn = _matmul_callable(M, K, N, TM, act, jnp.dtype(out_dtype).name)
    return fn(a, params["w"], params["b"])


# ---------------------------------------------------------------------------
# Reducer plan helpers (shared by L1 / BCE kernels)
# ---------------------------------------------------------------------------
def _to_2d(x):
    """Free (contiguous) 2-D view with a reasonably wide lane dimension."""
    if x.ndim == 0:
        return x.reshape(1, 1)
    if x.ndim == 1:
        return x.reshape(1, -1)
    if x.ndim == 2 or x.shape[-1] >= 128:
        return x.reshape(-1, x.shape[-1])
    return x.reshape(-1, x.shape[-2] * x.shape[-1])


def _reduce_plan(R, L):
    blk = max(1, _RED_TARGET_ELEMS // max(L, 1))
    blk = min(blk, _RED_ROW_CAP)
    blk = max(8, (blk // 8) * 8)
    if R <= blk:
        blk = R
    nblk = pl.cdiv(R, blk)
    npart = 2 if nblk >= 2 else 1     # 2 partials -> megacore-friendly on v7x
    inner = pl.cdiv(nblk, npart)
    need_mask = (R % blk != 0) or (npart * inner != nblk)
    return blk, nblk, npart, inner, need_mask


def _mask_block(v, c, i, *, rows, blk, inner, last_blk):
    g = c * inner + i
    base = jnp.minimum(g, last_blk) * blk
    rid = jax.lax.broadcasted_iota(jnp.int32, v.shape, 0) + base
    return jnp.where((rid < rows) & (g <= last_blk), v, 0.0)


# ---------------------------------------------------------------------------
# Pallas kernel 2: tiled sum(|x - y|) reduction (L1 loss), 2 parallel partials
# ---------------------------------------------------------------------------
def _l1_sum_kernel(x_ref, y_ref, o_ref, *, rows, blk, inner, last_blk, need_mask):
    c = pl.program_id(0)
    i = pl.program_id(1)

    @pl.when(i == 0)
    def _():
        o_ref[0, 0] = jnp.float32(0.0)

    v = jnp.abs(x_ref[...].astype(jnp.float32) - y_ref[...].astype(jnp.float32))
    if need_mask:
        v = _mask_block(v, c, i, rows=rows, blk=blk, inner=inner, last_blk=last_blk)
    o_ref[0, 0] += jnp.sum(v)


@functools.lru_cache(maxsize=None)
def _l1_callable(R, L):
    blk, nblk, npart, inner, need_mask = _reduce_plan(R, L)
    last_blk = nblk - 1
    row_map = lambda c, i: (jnp.minimum(c * inner + i, last_blk), 0)
    kern = functools.partial(_l1_sum_kernel, rows=R, blk=blk, inner=inner,
                             last_blk=last_blk, need_mask=need_mask)
    return pl.pallas_call(
        kern,
        out_shape=jax.ShapeDtypeStruct((npart, 1), jnp.float32),
        grid_spec=pltpu.PrefetchScalarGridSpec(
            num_scalar_prefetch=0,
            grid=(npart, inner),
            in_specs=[pl.BlockSpec((blk, L), row_map)] * 2,
            out_specs=pl.BlockSpec((1, 1), lambda c, i: (c, 0),
                                   memory_space=pltpu.MemorySpace.SMEM)),
        compiler_params=_cp(("parallel", "arbitrary")),
    )


def l1_loss(x, y):
    n = x.size
    x2 = _to_2d(x)
    y2 = _to_2d(y)
    s = _l1_callable(x2.shape[0], x2.shape[1])(x2, y2)
    return jnp.sum(s) / jnp.float32(n)


# ---------------------------------------------------------------------------
# Pallas kernel 3: BCE loss against a constant target (nsgan adversarial loss)
# ---------------------------------------------------------------------------
def _bce_sum_kernel(x_ref, o_ref, *, target, rows, blk, inner, last_blk, need_mask):
    c = pl.program_id(0)
    i = pl.program_id(1)

    @pl.when(i == 0)
    def _():
        o_ref[0, 0] = jnp.float32(0.0)

    x = x_ref[...].astype(jnp.float32)
    if target == 1.0:
        ll = jnp.maximum(jnp.log(x), -100.0)          # PyTorch BCELoss log clamp
    else:
        ll = jnp.maximum(jnp.log(1.0 - x), -100.0)
    v = -ll
    if need_mask:
        v = _mask_block(v, c, i, rows=rows, blk=blk, inner=inner, last_blk=last_blk)
    o_ref[0, 0] += jnp.sum(v)


@functools.lru_cache(maxsize=None)
def _bce_callable(R, L, target):
    blk, nblk, npart, inner, need_mask = _reduce_plan(R, L)
    last_blk = nblk - 1
    row_map = lambda c, i: (jnp.minimum(c * inner + i, last_blk), 0)
    kern = functools.partial(_bce_sum_kernel, target=target, rows=R, blk=blk,
                             inner=inner, last_blk=last_blk, need_mask=need_mask)
    return pl.pallas_call(
        kern,
        out_shape=jax.ShapeDtypeStruct((npart, 1), jnp.float32),
        grid_spec=pltpu.PrefetchScalarGridSpec(
            num_scalar_prefetch=0,
            grid=(npart, inner),
            in_specs=[pl.BlockSpec((blk, L), row_map)],
            out_specs=pl.BlockSpec((1, 1), lambda c, i: (c, 0),
                                   memory_space=pltpu.MemorySpace.SMEM)),
        compiler_params=_cp(("parallel", "arbitrary")),
    )


def bce_loss_const_target(x, target):
    n = x.size
    x2 = _to_2d(x)
    s = _bce_callable(x2.shape[0], x2.shape[1], float(target))(x2)
    return jnp.sum(s) / jnp.float32(n)


# ---------------------------------------------------------------------------
# Pallas kernel 4: batched Gram matrices  G[b] = f[b]^T f[b]  (style loss)
# ---------------------------------------------------------------------------
def _gram_kernel(f_ref, o_ref, *, hw, thw, need_mask):
    t = pl.program_id(1)

    @pl.when(t == 0)
    def _():
        o_ref[...] = jnp.zeros_like(o_ref)

    f = f_ref[0]                                       # (THW, C) bf16
    if need_mask:
        rid = jax.lax.broadcasted_iota(jnp.int32, f.shape, 0) + t * thw
        f = jnp.where(rid < hw, f, jnp.zeros_like(f))
    o_ref[0] += jax.lax.dot_general(
        f, f, dimension_numbers=(((0,), (0,)), ((), ())),
        preferred_element_type=jnp.float32)


@functools.lru_cache(maxsize=None)
def _gram_callable(B, HW, C):
    THW = _GRAM_THW if HW >= _GRAM_THW else HW
    n_t = pl.cdiv(HW, THW)
    need_mask = (HW % THW) != 0
    kern = functools.partial(_gram_kernel, hw=HW, thw=THW, need_mask=need_mask)
    return pl.pallas_call(
        kern,
        out_shape=jax.ShapeDtypeStruct((B, C, C), jnp.float32),
        grid_spec=pltpu.PrefetchScalarGridSpec(
            num_scalar_prefetch=0,
            grid=(B, n_t),
            in_specs=[pl.BlockSpec((1, THW, C), lambda b, t: (b, t, 0))],
            out_specs=pl.BlockSpec((1, C, C), lambda b, t: (b, 0, 0))),
        compiler_params=_cp(("parallel", "arbitrary")),
    )


def gram_matrix(feat):
    """Matches StyleLoss.compute_gram: G = f @ f^T / (h*w*ch), shape (B,C,C)."""
    B, H, W, C = feat.shape
    HW = H * W
    f = feat.reshape(B, HW, C)
    g = _gram_callable(B, HW, C)(f)
    return g / jnp.float32(HW * C)


# ---------------------------------------------------------------------------
# Pallas kernel 5: fused image-gradient L1 loss (single pass over x and y)
# ---------------------------------------------------------------------------
def _grad_loss_kernel(x_ref, y_ref, ox_ref, oy_ref, *, C):
    @pl.when(pl.program_id(0) == 0)
    def _():
        ox_ref[0, 0] = jnp.float32(0.0)
        oy_ref[0, 0] = jnp.float32(0.0)
    d = x_ref[0] - y_ref[0]                            # (H, W*C) f32
    # TODO(synk): the C-lane-shifted slices are not 128-aligned; small cost at
    # 3 channels (tiny tensor relative to the conv/VGG path).
    ox_ref[0, 0] += jnp.sum(jnp.abs(d[:, C:] - d[:, :-C]))   # W-direction diff
    oy_ref[0, 0] += jnp.sum(jnp.abs(d[1:, :] - d[:-1, :]))   # H-direction diff


@functools.lru_cache(maxsize=None)
def _grad_loss_callable(B, H, WC, C):
    sm = lambda: pl.BlockSpec((1, 1), lambda b: (0, 0),
                              memory_space=pltpu.MemorySpace.SMEM)
    return pl.pallas_call(
        functools.partial(_grad_loss_kernel, C=C),
        out_shape=(jax.ShapeDtypeStruct((1, 1), jnp.float32),
                   jax.ShapeDtypeStruct((1, 1), jnp.float32)),
        grid_spec=pltpu.PrefetchScalarGridSpec(
            num_scalar_prefetch=0,
            grid=(B,),
            in_specs=[pl.BlockSpec((1, H, WC), lambda b: (b, 0, 0))] * 2,
            out_specs=(sm(), sm())),
        compiler_params=_cp(("arbitrary",)),
    )


def image_gradient_loss(x, y):
    # TODO(synk): the reference ImageGradientLoss definition is not provided;
    # using L1 between finite-difference image gradients as a stand-in.
    B, H, W, C = x.shape
    xf = x.reshape(B, H, W * C).astype(jnp.float32)
    yf = y.reshape(B, H, W * C).astype(jnp.float32)
    sx, sy = _grad_loss_callable(B, H, W * C, C)(xf, yf)
    return sx[0, 0] / (B * H * (W - 1) * C) + sy[0, 0] / (B * (H - 1) * W * C)


# ---------------------------------------------------------------------------
# Conv / pool glue around the Pallas matmul
# ---------------------------------------------------------------------------
def _im2col(x, kh, kw, stride, pad):
    B, H, W, C = x.shape
    xp = jnp.pad(x, ((0, 0), (pad, pad), (pad, pad), (0, 0)))
    Hout = (H + 2 * pad - kh) // stride + 1
    Wout = (W + 2 * pad - kw) // stride + 1
    cols = []
    for dy in range(kh):
        for dx in range(kw):
            cols.append(xp[:, dy:dy + stride * (Hout - 1) + 1:stride,
                           dx:dx + stride * (Wout - 1) + 1:stride, :])
    patches = jnp.concatenate(cols, axis=-1)           # (B, Hout, Wout, kh*kw*C)
    return patches.reshape(B * Hout * Wout, kh * kw * C), (B, Hout, Wout)


def conv2d(x, params, k, stride, pad, act="none", out_dtype=jnp.bfloat16):
    """x: NHWC; weights resident in VMEM inside the matmul kernel."""
    cols, (B, Ho, Wo) = _im2col(x.astype(jnp.bfloat16), k, k, stride, pad)
    out = conv_matmul(cols, params, act=act, out_dtype=out_dtype)
    return out.reshape(B, Ho, Wo, params["N"])


def maxpool2x2(x):
    B, H, W, C = x.shape
    return x.reshape(B, H // 2, 2, W // 2, 2, C).max(axis=(2, 4))


# ---------------------------------------------------------------------------
# Deterministic parameter init (synthetic: no pretrained checkpoints)
# ---------------------------------------------------------------------------
_VGG_CFG = [("1_1", 3, 64), ("1_2", 64, 64),
            ("2_1", 64, 128), ("2_2", 128, 128),
            ("3_1", 128, 256), ("3_2", 256, 256), ("3_3", 256, 256), ("3_4", 256, 256),
            ("4_1", 256, 512), ("4_2", 512, 512), ("4_3", 512, 512), ("4_4", 512, 512),
            ("5_1", 512, 512), ("5_2", 512, 512)]

_DISC_CFG = [(3, 64, 4, 2), (64, 128, 4, 2), (128, 256, 4, 2),
             (256, 512, 4, 1), (512, 1, 4, 1)]


def _he_conv(key, cin, cout, k):
    fan_in = k * k * cin
    w = jax.random.normal(key, (fan_in, cout), jnp.float32) * (2.0 / fan_in) ** 0.5
    return _prep_conv(w, jnp.zeros((cout,), jnp.float32))


def init_vgg_params(key):
    # TODO(synk): pretrained VGG19 weights cannot be loaded in-script; synthetic
    # deterministic He-init is used (conv structure matches torchvision VGG19).
    keys = jax.random.split(key, len(_VGG_CFG))
    return {name: _he_conv(k, cin, cout, 3)
            for k, (name, cin, cout) in zip(keys, _VGG_CFG)}


def init_disc_params(key):
    # TODO(synk): spectral_norm parameterization of the Discriminator is omitted
    # (weights are synthetic deterministic He-init, not a checkpoint load).
    keys = jax.random.split(key, len(_DISC_CFG))
    return [_he_conv(k, cin, cout, kk)
            for k, (cin, cout, kk, _) in zip(keys, _DISC_CFG)]


# ---------------------------------------------------------------------------
# VGG19 feature extractor (up to relu5_2, the deepest consumed activation)
# ---------------------------------------------------------------------------
def vgg_features(x, p):
    f = {}
    h = conv2d(x, p["1_1"], 3, 1, 1, act="relu"); f["relu1_1"] = h
    h = conv2d(h, p["1_2"], 3, 1, 1, act="relu"); f["relu1_2"] = h
    h = maxpool2x2(h)
    h = conv2d(h, p["2_1"], 3, 1, 1, act="relu"); f["relu2_1"] = h
    h = conv2d(h, p["2_2"], 3, 1, 1, act="relu"); f["relu2_2"] = h
    h = maxpool2x2(h)
    h = conv2d(h, p["3_1"], 3, 1, 1, act="relu"); f["relu3_1"] = h
    h = conv2d(h, p["3_2"], 3, 1, 1, act="relu"); f["relu3_2"] = h
    h = conv2d(h, p["3_3"], 3, 1, 1, act="relu"); f["relu3_3"] = h
    h = conv2d(h, p["3_4"], 3, 1, 1, act="relu"); f["relu3_4"] = h
    h = maxpool2x2(h)
    h = conv2d(h, p["4_1"], 3, 1, 1, act="relu"); f["relu4_1"] = h
    h = conv2d(h, p["4_2"], 3, 1, 1, act="relu"); f["relu4_2"] = h
    h = conv2d(h, p["4_3"], 3, 1, 1, act="relu"); f["relu4_3"] = h
    h = conv2d(h, p["4_4"], 3, 1, 1, act="relu"); f["relu4_4"] = h
    h = maxpool2x2(h)
    h = conv2d(h, p["5_1"], 3, 1, 1, act="relu"); f["relu5_1"] = h
    h = conv2d(h, p["5_2"], 3, 1, 1, act="relu"); f["relu5_2"] = h
    # relu5_3 / relu5_4 are never consumed by PerceptualLoss/StyleLoss -> skipped.
    return f


# ---------------------------------------------------------------------------
# EdgeConnectLoss (forward only)
# ---------------------------------------------------------------------------
class EdgeConnectLossPallas:
    def __init__(self, key,
                 disc_start=-1, content_start=-1, style_start=-1, gradient_start=-1,
                 gan_loss="nsgan",
                 g_adv_loss_weight=0.1, g_rec_loss_weight=1.0,
                 g_gradient_loss_weight=1.0, g_content_loss_weight=0.1,
                 g_style_loss_weight=250.0, norm_to_0_1=True):
        assert gan_loss == "nsgan"
        self.disc_start = disc_start
        self.content_start = content_start
        self.style_start = style_start
        self.gradient_start = gradient_start
        self.g_adv_loss_weight = g_adv_loss_weight
        self.g_rec_loss_weight = g_rec_loss_weight
        self.g_content_loss_weight = g_content_loss_weight
        self.g_style_loss_weight = g_style_loss_weight
        self.g_gradient_loss_weight = g_gradient_loss_weight
        self.norm_to_0_1 = norm_to_0_1
        self.perceptual_weights = [1.0, 1.0, 1.0, 1.0, 1.0]
        k_vgg, k_disc = jax.random.split(key)
        self.vgg_params = init_vgg_params(k_vgg)
        self.disc_params = init_disc_params(k_disc)

    # --- sub-modules -------------------------------------------------------
    def discriminator(self, x):
        p = self.disc_params
        h = conv2d(x, p[0], 4, 2, 1, act="lrelu")
        h = conv2d(h, p[1], 4, 2, 1, act="lrelu")
        h = conv2d(h, p[2], 4, 2, 1, act="lrelu")
        h = conv2d(h, p[3], 4, 1, 1, act="lrelu")
        # use_sigmoid=True (nsgan); keep the probability map in f32 for BCE.
        out = conv2d(h, p[4], 4, 1, 1, act="sigmoid", out_dtype=jnp.float32)
        return out, None

    def adversarial_loss(self, outputs, is_real, is_disc=None):
        # nsgan: BCE against a constant real/fake label
        return bce_loss_const_target(outputs, 1.0 if is_real else 0.0)

    def _perceptual_from_feats(self, xf, yf):
        names = ["relu1_1", "relu2_1", "relu3_1", "relu4_1", "relu5_1"]
        loss = jnp.float32(0.0)
        for w, n in zip(self.perceptual_weights, names):
            loss = loss + w * l1_loss(xf[n], yf[n])
        return loss

    def _style_from_feats(self, xf, yf):
        loss = jnp.float32(0.0)
        for n in ["relu2_2", "relu3_4", "relu4_4", "relu5_2"]:
            loss = loss + l1_loss(gram_matrix(xf[n]), gram_matrix(yf[n]))
        return loss

    # --- forward -----------------------------------------------------------
    def __call__(self, image, reconstruction, step, mask=None,
                 name="generator", other_loss=None, other_input=None):
        other_loss = other_loss or {}
        other_input = other_input or {}
        # NCHW (PyTorch) -> NHWC (kernel layout)
        img = jnp.transpose(image.astype(jnp.float32), (0, 2, 3, 1))
        rec = jnp.transpose(reconstruction.astype(jnp.float32), (0, 2, 3, 1))
        out = {}

        if name == "fdm":
            out["loss"] = l1_loss(rec, img) * self.g_rec_loss_weight

        elif name in ("generator", "fdm_decoder_tuning"):
            if mask is not None:
                m = 1.0 - jnp.transpose(mask.astype(jnp.float32), (0, 2, 3, 1))
                mask_mean = jnp.mean(m)
            else:
                m = None
                mask_mean = jnp.float32(1.0)
            gen_loss = jnp.float32(0.0)

            if self.g_adv_loss_weight > 0 and step >= self.disc_start:
                gen_fake, _ = self.discriminator(rec)
                adv = self.adversarial_loss(gen_fake, True, False) * self.g_adv_loss_weight
                out["adv_loss"] = adv
                gen_loss = gen_loss + adv
            if self.g_rec_loss_weight > 0:
                rl = l1_loss(rec, img) * self.g_rec_loss_weight / mask_mean
                out["rec_loss"] = rl
                gen_loss = gen_loss + rl
            if self.g_gradient_loss_weight > 0 and step >= self.gradient_start:
                gl = image_gradient_loss(rec, img) * self.g_gradient_loss_weight
                out["grad_loss"] = gl
                gen_loss = gen_loss + gl

            need_content = self.g_content_loss_weight > 0 and step >= self.content_start
            need_style = self.g_style_loss_weight > 0 and step >= self.style_start
            share = m is None           # no mask: style inputs == perceptual inputs
            rec_f = img_f = None
            if need_content or (need_style and share):
                # VGG features computed ONCE per image, shared across losses.
                rec_f = vgg_features(rec, self.vgg_params)
                img_f = vgg_features(img, self.vgg_params)
            if need_content:
                cl = self._perceptual_from_feats(rec_f, img_f) * self.g_content_loss_weight
                out["content_loss"] = cl
                gen_loss = gen_loss + cl
            if need_style:
                if share:
                    rec_fs, img_fs = rec_f, img_f
                else:
                    rec_fs = vgg_features(rec * m, self.vgg_params)
                    img_fs = vgg_features(img * m, self.vgg_params)
                sl = self._style_from_feats(rec_fs, img_fs) * self.g_style_loss_weight
                out["style_loss"] = sl
                gen_loss = gen_loss + sl
            if name == "fdm_decoder_tuning":
                lip = l1_loss(other_input["lost_feature"],
                              other_input["gt_feature"]) * self.g_rec_loss_weight
                out["fdm_loss"] = lip
                gen_loss = gen_loss + lip
            out["loss"] = gen_loss

        elif name == "discriminator":
            if step >= self.disc_start:
                dis_real, _ = self.discriminator(img)
                dis_fake, _ = self.discriminator(jax.lax.stop_gradient(rec))
                real_loss = self.adversarial_loss(dis_real, True, True)
                fake_loss = self.adversarial_loss(dis_fake, False, True)
                out = {"loss": (real_loss + fake_loss) / 2.0,
                       "real_loss": real_loss, "fake_loss": fake_loss}
            else:
                dis_real, _ = self.discriminator(img)
                out = {"loss": self.adversarial_loss(dis_real, True, True) * 0.0}
        else:
            raise ValueError("Unknown name: {}".format(name))

        for k in other_loss:
            out["loss"] = out["loss"] + other_loss[k]
            out[k] = other_loss[k]
        return out


# ---------------------------------------------------------------------------
if __name__ == "__main__":
    key = jax.random.PRNGKey(0)
    k_img, k_rec, k_param = jax.random.split(key, 3)
    # Small NCHW inputs (3 channels required by VGG / discriminator).
    image = jax.random.uniform(k_img, (2, 3, 32, 32), jnp.float32)
    reconstruction = jax.random.uniform(k_rec, (2, 3, 32, 32), jnp.float32)

    loss_mod = EdgeConnectLossPallas(k_param)
    gen_out = loss_mod(image, reconstruction, step=0, mask=None, name="generator")
    jax.block_until_ready(gen_out["loss"])
    dis_out = loss_mod(image, reconstruction, step=0, mask=None, name="discriminator")
    jax.block_until_ready(dis_out["loss"])
    print("KERNEL_OK")
</pallas_src>

<mosaic_0001>
module attributes {stable_mosaic.version = 11 : i64} {
  func.func @_mm_kernel(%arg0: i32, %arg1: memref<256x48xbf16, #tpu.memory_space<vmem>>, %arg2: memref<48x64xbf16, #tpu.memory_space<vmem>>, %arg3: memref<1x64xf32, #tpu.memory_space<vmem>>, %arg4: memref<256x64xbf16, #tpu.memory_space<vmem>>) attributes {dimension_semantics = [#tpu.dimension_semantics<parallel>], iteration_bounds = array<i64: 2>, scalar_prefetch = 0 : i64, scratch_operands = 0 : i64, tpu.core_type = #tpu.core_type<tc>, window_params = [{transform_indices = @transform_0, window_bounds = array<i64: 256, 48>}, {pipeline_mode = #tpu.pipeline_mode<synchronous>, transform_indices = @transform_1, window_bounds = array<i64: 48, 64>}, {pipeline_mode = #tpu.pipeline_mode<synchronous>, transform_indices = @transform_2, window_bounds = array<i64: 1, 64>}, {transform_indices = @transform_3, window_bounds = array<i64: 256, 64>}]} {
    %c0 = arith.constant 0 : index
    %c0_0 = arith.constant 0 : index
    %0 = vector.load %arg1[%c0, %c0_0] : memref<256x48xbf16, #tpu.memory_space<vmem>>, vector<256x48xbf16>
    %c0_1 = arith.constant 0 : index
    %c0_2 = arith.constant 0 : index
    %1 = vector.load %arg2[%c0_1, %c0_2] : memref<48x64xbf16, #tpu.memory_space<vmem>>, vector<48x64xbf16>
    %cst = arith.constant dense<0.000000e+00> : vector<256x64xf32>
    %2 = tpu.matmul %0, %1, %cst {dimension_numbers = #tpu.dot_dimension_numbers<[1], [0], [0], [1], [0, 0, 1, 1], [], []>} : vector<256x48xbf16>, vector<48x64xbf16>, vector<256x64xf32> -> vector<256x64xf32>
    %c0_3 = arith.constant 0 : index
    %c0_4 = arith.constant 0 : index
    %3 = vector.load %arg3[%c0_3, %c0_4] : memref<1x64xf32, #tpu.memory_space<vmem>>, vector<1x64xf32>
    %4 = vector.broadcast %3 : vector<1x64xf32> to vector<256x64xf32>
    %5 = arith.addf %2, %4 : vector<256x64xf32>
    %cst_5 = arith.constant 0.000000e+00 : f32
    %6 = vector.broadcast %cst_5 : f32 to vector<256x64xf32>
    %7 = arith.cmpf ogt, %5, %6 : vector<256x64xf32>
    %cst_6 = arith.constant 2.000000e-01 : f32
    %8 = vector.broadcast %cst_6 : f32 to vector<256x64xf32>
    %9 = arith.mulf %8, %5 : vector<256x64xf32>
    %10 = arith.select %7, %5, %9 : vector<256x64xi1>, vector<256x64xf32>
    %11 = arith.truncf %10 : vector<256x64xf32> to vector<256x64xbf16>
    %c0_7 = arith.constant 0 : index
    %c0_8 = arith.constant 0 : index
    %12 = vector.load %arg4[%c0_7, %c0_8] : memref<256x64xbf16, #tpu.memory_space<vmem>>, vector<256x64xbf16>
    tpu.vector_store %arg4[%c0_7, %c0_8], %11 {strides = array<i32>} : memref<256x64xbf16, #tpu.memory_space<vmem>>, vector<256x64xbf16>,
    return
  }
  func.func @transform_0(%arg0: i32) -> (i32, i32) {
    %c0_i32 = arith.constant 0 : i32
    %c0_i32_0 = arith.constant 0 : i32
    return %arg0, %c0_i32 : i32, i32
  }
  func.func @transform_1(%arg0: i32) -> (i32, i32) {
    %c0_i32 = arith.constant 0 : i32
    %c0_i32_0 = arith.constant 0 : i32
    %c0_i32_1 = arith.constant 0 : i32
    return %c0_i32, %c0_i32_0 : i32, i32
  }
  func.func @transform_2(%arg0: i32) -> (i32, i32) {
    %c0_i32 = arith.constant 0 : i32
    %c0_i32_0 = arith.constant 0 : i32
    %c0_i32_1 = arith.constant 0 : i32
    return %c0_i32, %c0_i32_0 : i32, i32
  }
  func.func @transform_3(%arg0: i32) -> (i32, i32) {
    %c0_i32 = arith.constant 0 : i32
    %c0_i32_0 = arith.constant 0 : i32
    return %arg0, %c0_i32 : i32, i32
  }
}

</mosaic_0001>

<bundles_post_ra>
// kernel: tpu_custom_call.1
= control target key start
LH: loop header
LB: loop body
LE: loop exit
PB: predicated region body
PF: predicated region fallthrough
CT: control target
= control target key end

     0   :  { %s1070_s12 = smov 0   ;;  %s1241_s0 = inlined_call_operand.vmem [shape: bf16[512,48], index: 0, kind: input, shape index: {}]   ;;  %s1242_s1 = inlined_call_operand.vmem [shape: bf16[48,64], index: 1, kind: input, shape index: {}]   ;;  %s1243_s2 = inlined_call_operand.vmem [shape: f32[1,64], index: 2, kind: input, shape index: {}]   ;;  %s1244_s3 = inlined_call_operand.vmem [shape: bf16[512,64], index: 3, kind: output, shape index: {}]  }
   0x1 LB: > { %s841_s13 = sadd.s32 4294967295, %s1048_s12   ;;  %p845_p0 = scmp.ge.s32.totalorder %s1048_s12, 1  ;;  %s1048_s12 = sphi %s1070_s12, %s13_s12  }
   0x2   : > { %p138_p1 = scmp.lt.s32.totalorder %s1048_s12, 3 }
   0x4   : > { %p139_p2 = pnand %p845_p0, %p138_p1 }
   0x5   : > { %v1023_v0 = vld [vmem:[%s1242_s1] sm:$0xff] (!%p139_p2)   ;;  %s846_s16 = sshll.u32 (!%p139_p2), %s841_s13, 5  ;;  %v1024_v1 = vld [vmem:[%s1242_s1 + $0x8] sm:$0xff] (!%p139_p2)   ;;  %v1025_v2 = vld [vmem:[%s1242_s1 + $0x10] sm:$0xff] (!%p139_p2)   ;;  %vm318_vm0 = vcmask (!%p139_p2), 392192   ;;  %vm752_vm1 = vcmask (!%p139_p2), 519168  }
   0x6   : > { %142 = sbr.rel (%p139_p2) target bundleno = 278 (0x116), region = 32  ;;  %p163_p3 = scmp.lt.s32.totalorder (!%p139_p2), %s846_s16, 63  ;;  %971 = vmatprep.subr.bf16.mxu0 (!%p139_p2), %v1023_v0  ;;  %1009 = vmatprep.subr.bf16.mxu1 (!%p139_p2), %v1023_v0  ;;  %v1132_v19 = vld [vmem:[%s1243_s2] ss:$0 sm:$0xff] (!%p139_p2) }
   0x7   : > { %972 = vmatpush3.bf16.msra.mxu0 (!%p139_p2), %v1023_v0  ;;  %1012 = vmatpush3.bf16.msra.mxu1 (!%p139_p2), %v1023_v0 }
   0x8   : > { %973 = vmatprep.subr.bf16.mxu0 (!%p139_p2), %v1024_v1  ;;  %1010 = vmatprep.subr.bf16.mxu1 (!%p139_p2), %v1024_v1 }
   0xb   : > { %974 = vmatpush3.bf16.msra.mxu0 (!%p139_p2), %v1024_v1  ;;  %1013 = vmatpush3.bf16.msra.mxu1 (!%p139_p2), %v1024_v1 }
   0xc   : > { %975 = vmatprep.subr.bf16.mxu0 (!%p139_p2), %v1025_v2  ;;  %1011 = vmatprep.subr.bf16.mxu1 (!%p139_p2), %v1025_v2 }
   0xd   : > { %s1246_s16 = smov (!%p163_p3, %s846_s16), 63 }
   0xe   : > { %s847_s21 = sshll.u32 %s1246_s16, 2 }
   0xf   : > { %s1095_s24 = scalar_lea.vmem %s1241_s0, %s847_s21  ;;  %976 = vmatpush3.bf16.msra.mxu0 %v1025_v2  ;;  %1014 = vmatpush3.bf16.msra.mxu1 %v1025_v2  ;;  %s1143_s29 = scalar_lea.vmem %s1244_s3, %s847_s21 }
  0x10   : > { %v1026_v3 = vld [vmem:[%s1095_s24] sm:$0xff]   ;;  %v1028_v5 = vld [vmem:[%s1095_s24 + $0x8] sm:$0xff]   ;;  %v1030_v7 = vld [vmem:[%s1095_s24 + $0x10] sm:$0xff]  }
  0x11   : > { %v1027_v4 = vld [vmem:[%s1095_s24 + $0x40] sm:$0xff]   ;;  %977 = vmatprep.mubr.msk.bf16.mxu0 %vm318_vm0, %v1026_v3  ;;  %v1029_v6 = vld [vmem:[%s1095_s24 + $0x48] sm:$0xff]   ;;  %v1031_v8 = vld [vmem:[%s1095_s24 + $0x50] sm:$0xff]  }
  0x12   : > { %993 = vmatprep.mubr.msk.bf16.mxu1 %vm318_vm0, %v1027_v4  ;;  %978 = vmatmul.mubr.msk.bf16.vlgmr.msra.gmra.mrb[0].mxu0 %vm318_vm0, %v1028_v5  ;;  %v1032_v9 = vld [vmem:[%s1095_s24 + $0x18] sm:$0xff]   ;;  %v1034_v11 = vld [vmem:[%s1095_s24 + $0x20] sm:$0xff]   ;;  %v1036_v13 = vld [vmem:[%s1095_s24 + $0x28] sm:$0xff]  }
  0x13   : > { %994 = vmatmul.mubr.msk.bf16.vlgmr.msra.gmra.mrb[0].mxu1 %vm318_vm0, %v1029_v6  ;;  %981 = vmatprep.mubr.msk.bf16.mxu0 %vm318_vm0, %v1030_v7  ;;  %v1033_v10 = vld [vmem:[%s1095_s24 + $0x58] sm:$0xff]   ;;  %v1035_v12 = vld [vmem:[%s1095_s24 + $0x60] sm:$0xff]   ;;  %v1037_v14 = vld [vmem:[%s1095_s24 + $0x68] sm:$0xff]  }
  0x14   : > { %997 = vmatprep.mubr.msk.bf16.mxu1 %vm318_vm0, %v1031_v8  ;;  %v1038_v15 = vld [vmem:[%s1095_s24 + $0x30] sm:$0xff]   ;;  %v1040_v17 = vld [vmem:[%s1095_s24 + $0x38] sm:$0xff]  }
  0x15   : > { %v1039_v16 = vld [vmem:[%s1095_s24 + $0x70] sm:$0xff]   ;;  %v1041_v18 = vld [vmem:[%s1095_s24 + $0x78] sm:$0xff]  }
  0x1a   : > { %982 = vmatmul.mubr.msk.bf16.gmra.mrb[4].mxu0 %vm318_vm0, %v1032_v9 }
  0x1b   : > { %998 = vmatmul.mubr.msk.bf16.gmra.mrb[4].mxu1 %vm318_vm0, %v1033_v10  ;;  %985 = vmatprep.mubr.msk.bf16.mxu0 %vm318_vm0, %v1034_v11 }
  0x1c   : > { %1001 = vmatprep.mubr.msk.bf16.mxu1 %vm318_vm0, %v1035_v12 }
  0x22   : > { %986 = vmatmul.mubr.msk.bf16.gmra.mrb[8].mxu0 %vm318_vm0, %v1036_v13 }
  0x23   : > { %1002 = vmatmul.mubr.msk.bf16.gmra.mrb[8].mxu1 %vm318_vm0, %v1037_v14  ;;  %989 = vmatprep.mubr.msk.bf16.mxu0 %vm318_vm0, %v1038_v15 }
  0x24   : > { %1005 = vmatprep.mubr.msk.bf16.mxu1 %vm318_vm0, %v1039_v16 }
  0x2a   : > { %990 = vmatmul.mubr.msk.bf16.gmra.mrb[12].mxu0 %vm318_vm0, %v1040_v17 }
  0x2b   : > { %1006 = vmatmul.mubr.msk.bf16.gmra.mrb[12].mxu1 %vm318_vm0, %v1041_v18 }
  0xe5   : > { %v979_v20 = vpop.f32.mrb[0].mxu0 }
  0xe6   : > { %v995_v21 = vpop.f32.mrb[0].mxu1  ;;  %v410_v22 = vadd.f32 %v979_v20, %v1132_v19  ;;  %v401_v24 = vpop.f32.mrb[1].mxu0 }
  0xe7   : > { %v474_v23 = vadd.f32 %v995_v21, %v1132_v19  ;;  %v465_v25 = vpop.f32.mrb[1].mxu1  ;;  %v402_v26 = vadd.f32 %v1132_v19, %v401_v24  ;;  %v980_v28 = vpop.f32.mrb[2].mxu0 }
  0xe8   : > { %v466_v27 = vadd.f32 %v1132_v19, %v465_v25  ;;  %v996_v29 = vpop.f32.mrb[2].mxu1  ;;  %vm530_vm2 = vcmp.gt.f32.partialorder %v410_v22, 0.0  ;;  %v562_v30 = vmul.f32 0.2, %v410_v22  ;;  %v413_v36 = vadd.f32 %v980_v28, %v1132_v19  ;;  %v404_v38 = vpop.f32.mrb[3].mxu0 }
  0xe9   : > { %vm546_vm3 = vcmp.gt.f32.partialorder %v474_v23, 0.0  ;;  %v578_v31 = vmul.f32 0.2, %v474_v23  ;;  %vm528_vm4 = vcmp.gt.f32.partialorder %v402_v26, 0.0  ;;  %v560_v32 = vmul.f32 0.2, %v402_v26 }
  0xea   : > { %vm544_vm5 = vcmp.gt.f32.partialorder %v466_v27, 0.0  ;;  %v576_v33 = vmul.f32 0.2, %v466_v27  ;;  %v594_v34 = vsel %vm530_vm2, %v410_v22, %v562_v30  ;;  %v477_v37 = vadd.f32 %v996_v29, %v1132_v19  ;;  %v468_v39 = vpop.f32.mrb[3].mxu1 }
  0xeb   : > { %v610_v35 = vsel %vm546_vm3, %v474_v23, %v578_v31  ;;  %v922_v40 = vpack.c.bf16 %v594_v34, %v594_v34  ;;  %v592_v42 = vsel %vm528_vm4, %v402_v26, %v560_v32  ;;  %vm531_vm6 = vcmp.gt.f32.partialorder %v413_v36, 0.0 }
  0xec   : > { %v938_v41 = vpack.c.bf16 %v610_v35, %v610_v35  ;;  %v608_v43 = vsel %vm544_vm5, %v466_v27, %v576_v33  ;;  %v920_v44 = vpack.c.bf16 %v592_v42, %v592_v42  ;;  %v563_v46 = vmul.f32 0.2, %v413_v36 }
  0xed   : > { %v936_v45 = vpack.c.bf16 %v608_v43, %v608_v43  ;;  %755 = vst.msk [vmem:[%s1143_s29 + $0x8] sm:$0xf] %vm752_vm1, %v922_v40  ;;  %vm547_vm7 = vcmp.gt.f32.partialorder %v477_v37, 0.0  ;;  %v579_v47 = vmul.f32 0.2, %v477_v37  ;;  %v405_v48 = vadd.f32 %v1132_v19, %v404_v38  ;;  %v983_v50 = vpop.f32.mrb[4].mxu0 }
  0xee   : > { %771 = vst.msk [vmem:[%s1143_s29 + $0x48] sm:$0xf] %vm752_vm1, %v938_v41  ;;  %v469_v49 = vadd.f32 %v1132_v19, %v468_v39  ;;  %v999_v51 = vpop.f32.mrb[4].mxu1  ;;  %753 = vst.msk [vmem:[%s1143_s29] sm:$0xf] %vm752_vm1, %v920_v44  ;;  %v595_v52 = vsel %vm531_vm6, %v413_v36, %v563_v46  ;;  %v426_v53 = vadd.f32 %v983_v50, %v1132_v19  ;;  %v417_v55 = vpop.f32.mrb[5].mxu0 }
  0xef   : > { %769 = vst.msk [vmem:[%s1143_s29 + $0x40] sm:$0xf] %vm752_vm1, %v936_v45  ;;  %v490_v54 = vadd.f32 %v999_v51, %v1132_v19  ;;  %v481_v56 = vpop.f32.mrb[5].mxu1  ;;  %v923_v57 = vpack.c.bf16 %v595_v52, %v595_v52  ;;  %v611_v58 = vsel %vm547_vm7, %v477_v37, %v579_v47  ;;  %vm529_vm8 = vcmp.gt.f32.partialorder %v405_v48, 0.0  ;;  %v984_v60 = vpop.f32.mrb[6].mxu0 }
  0xf0   : > { %v561_v59 = vmul.f32 0.2, %v405_v48  ;;  %v1000_v61 = vpop.f32.mrb[6].mxu1  ;;  %v939_v62 = vpack.c.bf16 %v611_v58, %v611_v58  ;;  %vm545_vm9 = vcmp.gt.f32.partialorder %v469_v49, 0.0  ;;  %v577_v63 = vmul.f32 0.2, %v469_v49 }
  0xf1   : > { %vm534_vm10 = vcmp.gt.f32.partialorder %v426_v53, 0.0  ;;  %v420_v0 = vpop.f32.mrb[7].mxu0  ;;  %v484_v1 = vpop.f32.mrb[7].mxu1  ;;  %756 = vst.msk [vmem:[%s1143_s29 + $0xc] sm:$0xf] %vm752_vm1, %v923_v57  ;;  %vm550_vm11 = vcmp.gt.f32.partialorder %v490_v54, 0.0  ;;  %v418_v7 = vadd.f32 %v1132_v19, %v417_v55  ;;  %v482_v8 = vadd.f32 %v1132_v19, %v481_v56 }
  0xf2   : > { %v593_v2 = vsel %vm529_vm8, %v405_v48, %v561_v59  ;;  %v566_v3 = vmul.f32 0.2, %v426_v53  ;;  %v582_v4 = vmul.f32 0.2, %v490_v54  ;;  %772 = vst.msk [vmem:[%s1143_s29 + $0x4c] sm:$0xf] %vm752_vm1, %v939_v62  ;;  %v609_v6 = vsel %vm545_vm9, %v469_v49, %v577_v63 }
  0xf3   : > { %v921_v5 = vpack.c.bf16 %v593_v2, %v593_v2  ;;  %v937_v9 = vpack.c.bf16 %v609_v6, %v609_v6  ;;  %v429_v12 = vadd.f32 %v984_v60, %v1132_v19  ;;  %vm532_vm12 = vcmp.gt.f32.partialorder %v418_v7, 0.0 }
  0xf4   : > { %v598_v10 = vsel %vm534_vm10, %v426_v53, %v566_v3  ;;  %v614_v11 = vsel %vm550_vm11, %v490_v54, %v582_v4  ;;  %v564_v15 = vmul.f32 0.2, %v418_v7  ;;  %vm548_vm13 = vcmp.gt.f32.partialorder %v482_v8, 0.0 }
  0xf5   : > { %754 = vst.msk [vmem:[%s1143_s29 + $0x4] sm:$0xf] %vm752_vm1, %v921_v5  ;;  %v926_v13 = vpack.c.bf16 %v598_v10, %v598_v10  ;;  %v942_v14 = vpack.c.bf16 %v614_v11, %v614_v11  ;;  %770 = vst.msk [vmem:[%s1143_s29 + $0x44] sm:$0xf] %vm752_vm1, %v937_v9  ;;  %v580_v16 = vmul.f32 0.2, %v482_v8  ;;  %v493_v20 = vadd.f32 %v1000_v61, %v1132_v19 }
  0xf6   : > { %vm535_vm14 = vcmp.gt.f32.partialorder %v429_v12, 0.0  ;;  %v567_v17 = vmul.f32 0.2, %v429_v12  ;;  %v596_v18 = vsel %vm532_vm12, %v418_v7, %v564_v15  ;;  %v421_v21 = vadd.f32 %v1132_v19, %v420_v0  ;;  %v987_v23 = vpop.f32.mrb[8].mxu0  ;;  %v1003_v24 = vpop.f32.mrb[8].mxu1 }
  0xf7   : > { %759 = vst.msk [vmem:[%s1143_s29 + $0x18] sm:$0xf] %vm752_vm1, %v926_v13  ;;  %775 = vst.msk [vmem:[%s1143_s29 + $0x58] sm:$0xf] %vm752_vm1, %v942_v14  ;;  %v485_v22 = vadd.f32 %v1132_v19, %v484_v1  ;;  %v924_v25 = vpack.c.bf16 %v596_v18, %v596_v18  ;;  %v612_v26 = vsel %vm548_vm13, %v482_v8, %v580_v16  ;;  %v433_v29 = vpop.f32.mrb[9].mxu0  ;;  %v497_v30 = vpop.f32.mrb[9].mxu1 }
  0xf8   : > { %v599_v27 = vsel %vm535_vm14, %v429_v12, %v567_v17  ;;  %v442_v28 = vadd.f32 %v987_v23, %v1132_v19  ;;  %v940_v31 = vpack.c.bf16 %v612_v26, %v612_v26  ;;  %vm551_vm15 = vcmp.gt.f32.partialorder %v493_v20, 0.0  ;;  %v988_v34 = vpop.f32.mrb[10].mxu0  ;;  %v1004_v35 = vpop.f32.mrb[10].mxu1 }
  0xf9   : > { %v927_v32 = vpack.c.bf16 %v599_v27, %v599_v27  ;;  %v583_v33 = vmul.f32 0.2, %v493_v20  ;;  %757 = vst.msk [vmem:[%s1143_s29 + $0x10] sm:$0xf] %vm752_vm1, %v924_v25  ;;  %vm533_vm0 = vcmp.gt.f32.partialorder %v421_v21, 0.0  ;;  %vm549_vm2 = vcmp.gt.f32.partialorder %v485_v22, 0.0 }
  0xfa   : > { %v565_v36 = vmul.f32 0.2, %v421_v21  ;;  %v581_v37 = vmul.f32 0.2, %v485_v22  ;;  %773 = vst.msk [vmem:[%s1143_s29 + $0x50] sm:$0xf] %vm752_vm1, %v940_v31  ;;  %v506_v40 = vadd.f32 %v1003_v24, %v1132_v19  ;;  %v434_v46 = vadd.f32 %v1132_v19, %v433_v29 }
  0xfb   : > { %760 = vst.msk [vmem:[%s1143_s29 + $0x1c] sm:$0xf] %vm752_vm1, %v927_v32  ;;  %v615_v38 = vsel %vm551_vm15, %v493_v20, %v583_v33  ;;  %vm538_vm3 = vcmp.gt.f32.partialorder %v442_v28, 0.0  ;;  %v570_v39 = vmul.f32 0.2, %v442_v28  ;;  %v436_v41 = vpop.f32.mrb[11].mxu0  ;;  %v498_v54 = vadd.f32 %v1132_v19, %v497_v30 }
  0xfc   : > { %v500_v42 = vpop.f32.mrb[11].mxu1  ;;  %v943_v43 = vpack.c.bf16 %v615_v38, %v615_v38  ;;  %v597_v44 = vsel %vm533_vm0, %v421_v21, %v565_v36  ;;  %v613_v45 = vsel %vm549_vm2, %v485_v22, %v581_v37  ;;  %vm554_vm4 = vcmp.gt.f32.partialorder %v506_v40, 0.0 }
  0xfd   : > { %v925_v47 = vpack.c.bf16 %v597_v44, %v597_v44  ;;  %v941_v48 = vpack.c.bf16 %v613_v45, %v613_v45  ;;  %v602_v49 = vsel %vm538_vm3, %v442_v28, %v570_v39  ;;  %v586_v51 = vmul.f32 0.2, %v506_v40  ;;  %v991_v53 = vpop.f32.mrb[12].mxu0 }
  0xfe   : > { %776 = vst.msk [vmem:[%s1143_s29 + $0x5c] sm:$0xf] %vm752_vm1, %v943_v43  ;;  %v930_v50 = vpack.c.bf16 %v602_v49, %v602_v49  ;;  %vm536_vm5 = vcmp.gt.f32.partialorder %v434_v46, 0.0  ;;  %v568_v52 = vmul.f32 0.2, %v434_v46  ;;  %v445_v55 = vadd.f32 %v988_v34, %v1132_v19  ;;  %v1007_v58 = vpop.f32.mrb[12].mxu1 }
  0xff   : > { %758 = vst.msk [vmem:[%s1143_s29 + $0x14] sm:$0xf] %vm752_vm1, %v925_v47  ;;  %774 = vst.msk [vmem:[%s1143_s29 + $0x54] sm:$0xf] %vm752_vm1, %v941_v48  ;;  %v509_v56 = vadd.f32 %v1004_v35, %v1132_v19  ;;  %v437_v57 = vadd.f32 %v1132_v19, %v436_v41  ;;  %v449_v59 = vpop.f32.mrb[13].mxu0  ;;  %v618_v60 = vsel %vm554_vm4, %v506_v40, %v586_v51  ;;  %v513_v0 = vpop.f32.mrb[13].mxu1 }
 0x100   : > { %763 = vst.msk [vmem:[%s1143_s29 + $0x28] sm:$0xf] %vm752_vm1, %v930_v50  ;;  %v600_v61 = vsel %vm536_vm5, %v434_v46, %v568_v52  ;;  %v501_v62 = vadd.f32 %v1132_v19, %v500_v42  ;;  %v458_v63 = vadd.f32 %v991_v53, %v1132_v19  ;;  %v992_v1 = vpop.f32.mrb[14].mxu0  ;;  %v946_v2 = vpack.c.bf16 %v618_v60, %v618_v60  ;;  %v1008_v5 = vpop.f32.mrb[14].mxu1 }
 0x101   : > { %v928_v3 = vpack.c.bf16 %v600_v61, %v600_v61  ;;  %vm552_vm6 = vcmp.gt.f32.partialorder %v498_v54, 0.0  ;;  %v584_v4 = vmul.f32 0.2, %v498_v54  ;;  %v452_v6 = vpop.f32.mrb[15].mxu0  ;;  %vm539_vm7 = vcmp.gt.f32.partialorder %v445_v55, 0.0  ;;  %v516_v11 = vpop.f32.mrb[15].mxu1 }
 0x102   : > { %v571_v7 = vmul.f32 0.2, %v445_v55  ;;  %vm555_vm8 = vcmp.gt.f32.partialorder %v509_v56, 0.0  ;;  %v587_v8 = vmul.f32 0.2, %v509_v56  ;;  %vm537_vm9 = vcmp.gt.f32.partialorder %v437_v57, 0.0 }
 0x103   : > { %779 = vst.msk [vmem:[%s1143_s29 + $0x68] sm:$0xf] %vm752_vm1, %v946_v2  ;;  %761 = vst.msk [vmem:[%s1143_s29 + $0x20] sm:$0xf] %vm752_vm1, %v928_v3  ;;  %v616_v9 = vsel %vm552_vm6, %v498_v54, %v584_v4  ;;  %v569_v10 = vmul.f32 0.2, %v437_v57  ;;  %v522_v23 = vadd.f32 %v1007_v58, %v1132_v19  ;;  %v450_v25 = vadd.f32 %v1132_v19, %v449_v59 }
 0x104   : > { %vm553_vm10 = vcmp.gt.f32.partialorder %v501_v62, 0.0  ;;  %v944_v12 = vpack.c.bf16 %v616_v9, %v616_v9  ;;  %v603_v13 = vsel %vm539_vm7, %v445_v55, %v571_v7  ;;  %v619_v14 = vsel %vm555_vm8, %v509_v56, %v587_v8 }
 0x105   : > { %v585_v15 = vmul.f32 0.2, %v501_v62  ;;  %v931_v16 = vpack.c.bf16 %v603_v13, %v603_v13  ;;  %v947_v17 = vpack.c.bf16 %v619_v14, %v619_v14  ;;  %v601_v18 = vsel %vm537_vm9, %v437_v57, %v569_v10 }
 0x106   : > { %vm542_vm11 = vcmp.gt.f32.partialorder %v458_v63, 0.0  ;;  %777 = vst.msk [vmem:[%s1143_s29 + $0x60] sm:$0xf] %vm752_vm1, %v944_v12  ;;  %v929_v20 = vpack.c.bf16 %v601_v18, %v601_v18  ;;  %v574_v22 = vmul.f32 0.2, %v458_v63  ;;  %v514_v26 = vadd.f32 %v1132_v19, %v513_v0 }
 0x107   : > { %v617_v21 = vsel %vm553_vm10, %v501_v62, %v585_v15  ;;  %764 = vst.msk [vmem:[%s1143_s29 + $0x2c] sm:$0xf] %vm752_vm1, %v931_v16  ;;  %780 = vst.msk [vmem:[%s1143_s29 + $0x6c] sm:$0xf] %vm752_vm1, %v947_v17  ;;  %v461_v27 = vadd.f32 %v992_v1, %v1132_v19  ;;  %vm558_vm12 = vcmp.gt.f32.partialorder %v522_v23, 0.0  ;;  %v525_v30 = vadd.f32 %v1008_v5, %v1132_v19 }
 0x108   : > { %v945_v24 = vpack.c.bf16 %v617_v21, %v617_v21  ;;  %762 = vst.msk [vmem:[%s1143_s29 + $0x24] sm:$0xf] %vm752_vm1, %v929_v20  ;;  %v606_v28 = vsel %vm542_vm11, %v458_v63, %v574_v22  ;;  %v590_v29 = vmul.f32 0.2, %v522_v23  ;;  %vm540_vm13 = vcmp.gt.f32.partialorder %v450_v25, 0.0 }
 0x109   : > { %v934_v31 = vpack.c.bf16 %v606_v28, %v606_v28  ;;  %v572_v32 = vmul.f32 0.2, %v450_v25  ;;  %vm556_vm14 = vcmp.gt.f32.partialorder %v514_v26, 0.0  ;;  %v588_v34 = vmul.f32 0.2, %v514_v26 }
 0x10a   : > { %778 = vst.msk [vmem:[%s1143_s29 + $0x64] sm:$0xf] %vm752_vm1, %v945_v24  ;;  %v622_v33 = vsel %vm558_vm12, %v522_v23, %v590_v29  ;;  %vm543_vm15 = vcmp.gt.f32.partialorder %v461_v27, 0.0  ;;  %v575_v35 = vmul.f32 0.2, %v461_v27  ;;  %vm559_vm0 = vcmp.gt.f32.partialorder %v525_v30, 0.0 }
 0x10b   : > { %767 = vst.msk [vmem:[%s1143_s29 + $0x38] sm:$0xf] %vm752_vm1, %v934_v31  ;;  %v950_v36 = vpack.c.bf16 %v622_v33, %v622_v33  ;;  %v604_v37 = vsel %vm540_vm13, %v450_v25, %v572_v32  ;;  %v591_v38 = vmul.f32 0.2, %v525_v30  ;;  %v620_v40 = vsel %vm556_vm14, %v514_v26, %v588_v34 }
 0x10c   : > { %v932_v39 = vpack.c.bf16 %v604_v37, %v604_v37  ;;  %v607_v41 = vsel %vm543_vm15, %v461_v27, %v575_v35  ;;  %v453_v42 = vadd.f32 %v1132_v19, %v452_v6  ;;  %v948_v43 = vpack.c.bf16 %v620_v40, %v620_v40 }
 0x10d   : > { %783 = vst.msk [vmem:[%s1143_s29 + $0x78] sm:$0xf] %vm752_vm1, %v950_v36  ;;  %v935_v44 = vpack.c.bf16 %v607_v41, %v607_v41  ;;  %v623_v45 = vsel %vm559_vm0, %v525_v30, %v591_v38  ;;  %v517_v46 = vadd.f32 %v1132_v19, %v516_v11 }
 0x10e   : > { %765 = vst.msk [vmem:[%s1143_s29 + $0x30] sm:$0xf] %vm752_vm1, %v932_v39  ;;  %v951_v47 = vpack.c.bf16 %v623_v45, %v623_v45  ;;  %vm541_vm2 = vcmp.gt.f32.partialorder %v453_v42, 0.0  ;;  %v573_v48 = vmul.f32 0.2, %v453_v42 }
 0x10f   : > { %781 = vst.msk [vmem:[%s1143_s29 + $0x70] sm:$0xf] %vm752_vm1, %v948_v43  ;;  %768 = vst.msk [vmem:[%s1143_s29 + $0x3c] sm:$0xf] %vm752_vm1, %v935_v44  ;;  %vm557_vm3 = vcmp.gt.f32.partialorder %v517_v46, 0.0 }
 0x110   : > { %v589_v49 = vmul.f32 0.2, %v517_v46  ;;  %784 = vst.msk [vmem:[%s1143_s29 + $0x7c] sm:$0xf] %vm752_vm1, %v951_v47  ;;  %v605_v50 = vsel %vm541_vm2, %v453_v42, %v573_v48 }
 0x111   : > { %v933_v51 = vpack.c.bf16 %v605_v50, %v605_v50 }
 0x112   : > { %v621_v52 = vsel %vm557_vm3, %v517_v46, %v589_v49 }
 0x113   : > { %v949_v53 = vpack.c.bf16 %v621_v52, %v621_v52  ;;  %766 = vst.msk [vmem:[%s1143_s29 + $0x34] sm:$0xf] %vm752_vm1, %v933_v51 }
 0x115   : > { %782 = vst.msk [vmem:[%s1143_s29 + $0x74] sm:$0xf] %vm752_vm1, %v949_v53 }
 0x116 PF: > { %s13_s12 = sadd.s32 1, %s1048_s12  }
 0x117   : > { %p10_p4 = scmp.ge.s32.totalorder %s13_s12, 4  }
 0x119   :  { %12 = sbr.rel (!%p10_p4) target bundleno = 1 (0x1), region = 62 }

</bundles_post_ra>
